<compile_context>
chip_gen: v7x
topology: tpu7x:2x2x1
jax: 0.10.0
libtpu: 0.0.40
codegen_flags: <defaults>
</compile_context>

<pallas_src>
import functools

import numpy as np
import jax
import jax.numpy as jnp
from jax import lax
from jax.experimental import pallas as pl
from jax.experimental.pallas import tpu as pltpu

MATMUL_DTYPE = jnp.bfloat16   # MXU-native operand dtype; accumulation is f32.


# ----------------------------- fused Pallas kernel ---------------------------

def _basic_block_kernel(xph_ref, mask_ref, w1c_ref, g1_ref, b1_ref,
                        w2c_ref, g2_ref, b2_ref, o_ref,
                        slab1_ref, slab2_ref, *, stride, Wo, eps):
    """Whole BasicBlock forward in transposed (C, M) layout, M on lanes.

    Lane index m flattens (n, ho, wo) in exactly that order; the lane rolls
    below rely on that order, and cross-row / cross-batch wraparound is zeroed
    by the precomputed boundary masks.
    """
    Cout, M = o_ref.shape
    Cp = xph_ref.shape[1]                    # padded input-channel rows
    inv_m = 1.0 / M

    def valid(dh, dw):                       # (1, M) {0,1} f32 boundary mask
        return mask_ref[pl.ds((dh + 1) * 3 + (dw + 1), 1), :]

    # ---- conv1 (3x3, stride s) + 1x1 shortcut: build ONE (10*Cp, M) slab ----
    # Phase decomposition: tap (dh, dw) of the stride-s conv reads input phase
    # (dh mod s, dw mod s) shifted by (dh // s, dw // s) on the (Ho, Wo) grid,
    # so every tap is a lane roll + mask of a VMEM-resident phase slice.
    for t in range(9):
        dh, dw = t // 3 - 1, t % 3 - 1
        a, ph = divmod(dh, stride)
        b, pw = divmod(dw, stride)
        x_ph = xph_ref[ph * stride + pw]                     # (Cp, M) f32
        off = a * Wo + b
        if off == 0:
            piece = x_ph
        else:
            piece = pltpu.roll(x_ph, shift=(-off) % M, axis=1) * valid(a, b)
        slab1_ref[pl.ds(t * Cp, Cp), :] = piece              # aligned 8-row store
    slab1_ref[pl.ds(9 * Cp, Cp), :] = xph_ref[0]             # shortcut tap (phase 0,0)

    # conv1 + shortcut as one block-diagonal MXU matmul: rows 0:Cout = conv1,
    # rows Cout:2*Cout = 1x1 shortcut.
    y = jnp.dot(w1c_ref[...], slab1_ref[...].astype(MATMUL_DTYPE),
                preferred_element_type=jnp.float32)          # (2*Cout, M) f32
    y1 = y[:Cout]
    sc = y[Cout:]

    # ---- BN1 (training-mode batch stats over lanes, two-pass var) + ReLU ----
    mean1 = jnp.sum(y1, axis=1, keepdims=True) * inv_m
    c1 = y1 - mean1
    var1 = jnp.sum(c1 * c1, axis=1, keepdims=True) * inv_m
    a1 = jnp.maximum(
        c1 * (g1_ref[...] * lax.rsqrt(var1 + eps)) + b1_ref[...], 0.0)
    # a1 stays resident in VMEM/vregs: it never touches HBM.

    # ---- conv2 (3x3, stride 1): 9 rolled/masked taps -> ONE (9*Cout, M) slab -
    for t in range(9):
        dh, dw = t // 3 - 1, t % 3 - 1
        off = dh * Wo + dw
        if off == 0:
            piece = a1
        else:
            piece = pltpu.roll(a1, shift=(-off) % M, axis=1) * valid(dh, dw)
        slab2_ref[pl.ds(t * Cout, Cout), :] = piece
    y2 = jnp.dot(w2c_ref[...], slab2_ref[...].astype(MATMUL_DTYPE),
                 preferred_element_type=jnp.float32)         # (Cout, M) f32

    # ---- BN2 + residual add + final ReLU (full-lane unmasked store) ---------
    mean2 = jnp.sum(y2, axis=1, keepdims=True) * inv_m
    c2 = y2 - mean2
    var2 = jnp.sum(c2 * c2, axis=1, keepdims=True) * inv_m
    o_ref[...] = jnp.maximum(
        c2 * (g2_ref[...] * lax.rsqrt(var2 + eps)) + b2_ref[...] + sc, 0.0)


# ----------------------------- wrapper (host glue) ----------------------------

def basic_block_forward(x_nhwc, params, stride, eps=1e-5):
    w1, g1, b1, w2, g2, b2, w_sc = params
    N, H, W, Cin = x_nhwc.shape
    Cout = w1.shape[-1]
    assert H % stride == 0 and W % stride == 0
    Ho, Wo = H // stride, W // stride
    M = N * Ho * Wo
    # Lane-dense layout invariants: M rides the 128-wide lane axis, channels
    # ride sublanes.
    assert M % 128 == 0, "N*Ho*Wo must be a multiple of 128 (lane-dense layout)"
    assert Cout % 8 == 0, "out_planes must be a multiple of 8 (sublane tile)"
    Cp = ((Cin + 7) // 8) * 8          # input channels padded to a sublane tile

    # --- space-to-depth phase split of x (stride-s conv -> s^2 phases) -------
    phases = []
    for ph in range(stride):
        for pw in range(stride):
            xp = x_nhwc[:, ph::stride, pw::stride, :]        # (N, Ho, Wo, Cin)
            xp = xp.reshape(M, Cin).T                        # (Cin, M) lane-dense
            phases.append(jnp.pad(xp, ((0, Cp - Cin), (0, 0))))
    xph = jnp.stack(phases, axis=0).astype(jnp.float32)      # (s^2, Cp, M)

    # --- (9, M) boundary-validity masks for 3x3 offsets on the (Ho, Wo) grid --
    ho_g = np.arange(Ho).reshape(Ho, 1)
    wo_g = np.arange(Wo).reshape(1, Wo)
    mrows = []
    for t in range(9):
        dh, dw = t // 3 - 1, t % 3 - 1
        m = ((ho_g + dh >= 0) & (ho_g + dh < Ho) &
             (wo_g + dw >= 0) & (wo_g + dw < Wo)).astype(np.float32)
        mrows.append(np.tile(m.reshape(-1), N))
    mask = jnp.asarray(np.stack(mrows, axis=0))              # (9, M) f32

    # --- conv1 + shortcut block-diagonal weight: (2*Cout, 10*Cp) bf16 ---------
    cpad = jnp.zeros((Cp - Cin, Cout), jnp.float32)
    w1_blocks = [jnp.concatenate([w1[t // 3, t % 3], cpad], axis=0)
                 for t in range(9)]                          # 9 x (Cp, Cout)
    top = jnp.concatenate(w1_blocks + [jnp.zeros((Cp, Cout), jnp.float32)], 0)
    bot = jnp.concatenate([jnp.zeros((9 * Cp, Cout), jnp.float32),
                           jnp.concatenate([w_sc, cpad], axis=0)], 0)
    w1c = jnp.concatenate([top, bot], axis=1).T.astype(MATMUL_DTYPE)

    # --- conv2 weight as (Cout, 9*Cout): single matmul with K = 9*Cout --------
    w2c = w2.reshape(9 * Cout, Cout).T.astype(MATMUL_DTYPE)

    g1c, b1c = g1.reshape(Cout, 1), b1.reshape(Cout, 1)
    g2c, b2c = g2.reshape(Cout, 1), b2.reshape(Cout, 1)

    kernel = functools.partial(_basic_block_kernel, stride=stride, Wo=Wo, eps=eps)

    flops = 2 * M * (2 * Cout) * (10 * Cp) + 2 * M * Cout * (9 * Cout)
    operands = (xph, mask, w1c, g1c, b1c, w2c, g2c, b2c)
    bytes_accessed = int(sum(a.size * a.dtype.itemsize for a in operands)
                         + M * Cout * 4)

    def full(shape):
        return pl.BlockSpec(shape, lambda i, _n=len(shape): (0,) * _n)

    # Single grid step: the whole (tiny) problem is VMEM-resident; default
    # double-buffering is wasted-but-negligible here since there is nothing to
    # overlap.
    # TODO(synk): for ResNet-sized M, tile M on a leading "parallel" grid axis
    #             (lane tile >= 512), switch BN to a two-pass stats/apply
    #             structure, and re-derive vmem_limit_bytes (v7x: 64 MiB/TC).
    # TODO(synk): chain blocks in (C, M) lane-dense layout (and bf16 output) so
    #             the phase-split / output-transpose glue disappears between
    #             blocks.
    out_t = pl.pallas_call(
        kernel,
        out_shape=jax.ShapeDtypeStruct((Cout, M), jnp.float32),
        grid=(1,),
        in_specs=[full(xph.shape), full(mask.shape), full(w1c.shape),
                  full(g1c.shape), full(b1c.shape), full(w2c.shape),
                  full(g2c.shape), full(b2c.shape)],
        out_specs=full((Cout, M)),
        scratch_shapes=[pltpu.VMEM((10 * Cp, M), jnp.float32),    # conv1+sc slab
                        pltpu.VMEM((9 * Cout, M), jnp.float32)],  # conv2 slab
        compiler_params=pltpu.CompilerParams(
            dimension_semantics=("arbitrary",),
            vmem_limit_bytes=64 * 1024 * 1024),
        cost_estimate=pl.CostEstimate(flops=flops, transcendentals=2 * Cout,
                                      bytes_accessed=bytes_accessed),
    )(xph, mask, w1c, g1c, b1c, w2c, g2c, b2c)

    return out_t.T.reshape(N, Ho, Wo, Cout)


# ----------------------------- pure-JAX reference ----------------------------

def reference_forward(x_nhwc, params, stride, eps=1e-5):
    w1, g1, b1, w2, g2, b2, w_sc = params

    def conv(x, w, s):
        return lax.conv_general_dilated(
            x, w, (s, s), ((1, 1), (1, 1)),
            dimension_numbers=("NHWC", "HWIO", "NHWC"))

    def bn(x, g, b):
        mean = x.mean(axis=(0, 1, 2))
        var = x.var(axis=(0, 1, 2))
        return (x - mean) / jnp.sqrt(var + eps) * g.reshape(-1) + b.reshape(-1)

    o = jax.nn.relu(bn(conv(x_nhwc, w1, stride), g1, b1))
    o = bn(conv(o, w2, 1), g2, b2)
    sc = jnp.einsum("nhwc,co->nhwo", x_nhwc[:, ::stride, ::stride, :], w_sc)
    return jax.nn.relu(o + sc)


# ----------------------------------- main -------------------------------------

if __name__ == "__main__":
    # BasicBlock(in_planes=4, out_planes=8, stride=2)
    # -> shortcut is a strided 1x1 conv (stride != 1 and in != out).
    N, Cin, H, W = 2, 4, 16, 16
    Cout, stride = 8, 2

    key = jax.random.PRNGKey(0)
    kx, k1, k2, k3, k4, k5, k6, k7 = jax.random.split(key, 8)

    x_nchw = jax.random.normal(kx, (N, Cin, H, W), dtype=jnp.float32)
    x_nhwc = jnp.transpose(x_nchw, (0, 2, 3, 1))

    # Deterministic synthetic parameters (shapes follow nn.Conv2d/BatchNorm2d).
    w1 = 0.1 * jax.random.normal(k1, (3, 3, Cin, Cout), dtype=jnp.float32)   # conv1 (HWIO)
    g1 = 1.0 + 0.1 * jax.random.normal(k2, (1, Cout), dtype=jnp.float32)     # bn1 gamma
    b1 = 0.1 * jax.random.normal(k3, (1, Cout), dtype=jnp.float32)           # bn1 beta
    w2 = 0.1 * jax.random.normal(k4, (3, 3, Cout, Cout), dtype=jnp.float32)  # conv2 (HWIO)
    g2 = 1.0 + 0.1 * jax.random.normal(k5, (1, Cout), dtype=jnp.float32)     # bn2 gamma
    b2 = 0.1 * jax.random.normal(k6, (1, Cout), dtype=jnp.float32)           # bn2 beta
    if stride != 1 or Cin != Cout:
        w_sc = 0.1 * jax.random.normal(k7, (Cin, Cout), dtype=jnp.float32)   # 1x1 shortcut conv
    else:
        w_sc = jnp.eye(Cin, dtype=jnp.float32)                               # identity shortcut

    params = (w1, g1, b1, w2, g2, b2, w_sc)

    out = basic_block_forward(x_nhwc, params, stride)
    out = jax.block_until_ready(out)

    ref = reference_forward(x_nhwc, params, stride)
    assert out.shape == (N, H // stride, W // stride, Cout)
    max_err = float(jnp.max(jnp.abs(out - ref)))
    # bf16 MXU operands with f32 accumulation vs. a pure-f32 reference.
    assert max_err < 5e-2, max_err

    print("KERNEL_OK")
</pallas_src>

<mosaic_0001>
module attributes {stable_mosaic.version = 11 : i64} {
  func.func @_basic_block_kernel(%arg0: i32, %arg1: memref<4x8x128xf32, #tpu.memory_space<vmem>>, %arg2: memref<9x128xf32, #tpu.memory_space<vmem>>, %arg3: memref<16x80xbf16, #tpu.memory_space<vmem>>, %arg4: memref<8x1xf32, #tpu.memory_space<vmem>>, %arg5: memref<8x1xf32, #tpu.memory_space<vmem>>, %arg6: memref<8x72xbf16, #tpu.memory_space<vmem>>, %arg7: memref<8x1xf32, #tpu.memory_space<vmem>>, %arg8: memref<8x1xf32, #tpu.memory_space<vmem>>, %arg9: memref<8x128xf32, #tpu.memory_space<vmem>>, %arg10: memref<80x128xf32, #tpu.memory_space<vmem>>, %arg11: memref<72x128xf32, #tpu.memory_space<vmem>>) attributes {dimension_semantics = [#tpu.dimension_semantics<arbitrary>], iteration_bounds = array<i64: 1>, scalar_prefetch = 0 : i64, scratch_operands = 2 : i64, tpu.core_type = #tpu.core_type<tc>, window_params = [{pipeline_mode = #tpu.pipeline_mode<synchronous>, transform_indices = @transform_0, window_bounds = array<i64: 4, 8, 128>}, {pipeline_mode = #tpu.pipeline_mode<synchronous>, transform_indices = @transform_1, window_bounds = array<i64: 9, 128>}, {pipeline_mode = #tpu.pipeline_mode<synchronous>, transform_indices = @transform_2, window_bounds = array<i64: 16, 80>}, {pipeline_mode = #tpu.pipeline_mode<synchronous>, transform_indices = @transform_3, window_bounds = array<i64: 8, 1>}, {pipeline_mode = #tpu.pipeline_mode<synchronous>, transform_indices = @transform_4, window_bounds = array<i64: 8, 1>}, {pipeline_mode = #tpu.pipeline_mode<synchronous>, transform_indices = @transform_5, window_bounds = array<i64: 8, 72>}, {pipeline_mode = #tpu.pipeline_mode<synchronous>, transform_indices = @transform_6, window_bounds = array<i64: 8, 1>}, {pipeline_mode = #tpu.pipeline_mode<synchronous>, transform_indices = @transform_7, window_bounds = array<i64: 8, 1>}, {pipeline_mode = #tpu.pipeline_mode<synchronous>, transform_indices = @transform_8, window_bounds = array<i64: 8, 128>}]} {
    %c3 = arith.constant 3 : index
    %c0 = arith.constant 0 : index
    %c0_0 = arith.constant 0 : index
    %0 = vector.load %arg1[%c3, %c0, %c0_0] : memref<4x8x128xf32, #tpu.memory_space<vmem>>, vector<1x8x128xf32>
    %1 = vector.shape_cast %0 : vector<1x8x128xf32> to vector<8x128xf32>
    %c9_i32 = arith.constant 9 : i32
    %2 = tpu.dynamic_rotate %1 by %c9_i32 dim 1 : vector<8x128xf32>, i32 -> vector<8x128xf32>
    %c0_1 = arith.constant 0 : index
    %c0_2 = arith.constant 0 : index
    %3 = vector.load %arg2[%c0_1, %c0_2] : memref<9x128xf32, #tpu.memory_space<vmem>>, vector<1x128xf32>
    %4 = vector.broadcast %3 : vector<1x128xf32> to vector<8x128xf32>
    %5 = arith.mulf %2, %4 : vector<8x128xf32>
    %c0_3 = arith.constant 0 : index
    %c0_4 = arith.constant 0 : index
    %6 = vector.load %arg10[%c0_3, %c0_4] : memref<80x128xf32, #tpu.memory_space<vmem>>, vector<8x128xf32>
    tpu.vector_store %arg10[%c0_3, %c0_4], %5 {strides = array<i32>} : memref<80x128xf32, #tpu.memory_space<vmem>>, vector<8x128xf32>,
    %c2 = arith.constant 2 : index
    %c0_5 = arith.constant 0 : index
    %c0_6 = arith.constant 0 : index
    %7 = vector.load %arg1[%c2, %c0_5, %c0_6] : memref<4x8x128xf32, #tpu.memory_space<vmem>>, vector<1x8x128xf32>
    %8 = vector.shape_cast %7 : vector<1x8x128xf32> to vector<8x128xf32>
    %c8_i32 = arith.constant 8 : i32
    %9 = tpu.dynamic_rotate %8 by %c8_i32 dim 1 : vector<8x128xf32>, i32 -> vector<8x128xf32>
    %c1 = arith.constant 1 : index
    %c0_7 = arith.constant 0 : index
    %10 = vector.load %arg2[%c1, %c0_7] : memref<9x128xf32, #tpu.memory_space<vmem>>, vector<1x128xf32>
    %11 = vector.broadcast %10 : vector<1x128xf32> to vector<8x128xf32>
    %12 = arith.mulf %9, %11 : vector<8x128xf32>
    %c8 = arith.constant 8 : index
    %c0_8 = arith.constant 0 : index
    %13 = vector.load %arg10[%c8, %c0_8] : memref<80x128xf32, #tpu.memory_space<vmem>>, vector<8x128xf32>
    tpu.vector_store %arg10[%c8, %c0_8], %12 {strides = array<i32>} : memref<80x128xf32, #tpu.memory_space<vmem>>, vector<8x128xf32>,
    %c3_9 = arith.constant 3 : index
    %c0_10 = arith.constant 0 : index
    %c0_11 = arith.constant 0 : index
    %14 = vector.load %arg1[%c3_9, %c0_10, %c0_11] : memref<4x8x128xf32, #tpu.memory_space<vmem>>, vector<1x8x128xf32>
    %15 = vector.shape_cast %14 : vector<1x8x128xf32> to vector<8x128xf32>
    %c8_i32_12 = arith.constant 8 : i32
    %16 = tpu.dynamic_rotate %15 by %c8_i32_12 dim 1 : vector<8x128xf32>, i32 -> vector<8x128xf32>
    %c1_13 = arith.constant 1 : index
    %c0_14 = arith.constant 0 : index
    %17 = vector.load %arg2[%c1_13, %c0_14] : memref<9x128xf32, #tpu.memory_space<vmem>>, vector<1x128xf32>
    %18 = vector.broadcast %17 : vector<1x128xf32> to vector<8x128xf32>
    %19 = arith.mulf %16, %18 : vector<8x128xf32>
    %c16 = arith.constant 16 : index
    %c0_15 = arith.constant 0 : index
    %20 = vector.load %arg10[%c16, %c0_15] : memref<80x128xf32, #tpu.memory_space<vmem>>, vector<8x128xf32>
    tpu.vector_store %arg10[%c16, %c0_15], %19 {strides = array<i32>} : memref<80x128xf32, #tpu.memory_space<vmem>>, vector<8x128xf32>,
    %c1_16 = arith.constant 1 : index
    %c0_17 = arith.constant 0 : index
    %c0_18 = arith.constant 0 : index
    %21 = vector.load %arg1[%c1_16, %c0_17, %c0_18] : memref<4x8x128xf32, #tpu.memory_space<vmem>>, vector<1x8x128xf32>
    %22 = vector.shape_cast %21 : vector<1x8x128xf32> to vector<8x128xf32>
    %c1_i32 = arith.constant 1 : i32
    %23 = tpu.dynamic_rotate %22 by %c1_i32 dim 1 : vector<8x128xf32>, i32 -> vector<8x128xf32>
    %c3_19 = arith.constant 3 : index
    %c0_20 = arith.constant 0 : index
    %24 = vector.load %arg2[%c3_19, %c0_20] : memref<9x128xf32, #tpu.memory_space<vmem>>, vector<1x128xf32>
    %25 = vector.broadcast %24 : vector<1x128xf32> to vector<8x128xf32>
    %26 = arith.mulf %23, %25 : vector<8x128xf32>
    %c24 = arith.constant 24 : index
    %c0_21 = arith.constant 0 : index
    %27 = vector.load %arg10[%c24, %c0_21] : memref<80x128xf32, #tpu.memory_space<vmem>>, vector<8x128xf32>
    tpu.vector_store %arg10[%c24, %c0_21], %26 {strides = array<i32>} : memref<80x128xf32, #tpu.memory_space<vmem>>, vector<8x128xf32>,
    %c0_22 = arith.constant 0 : index
    %c0_23 = arith.constant 0 : index
    %c0_24 = arith.constant 0 : index
    %28 = vector.load %arg1[%c0_22, %c0_23, %c0_24] : memref<4x8x128xf32, #tpu.memory_space<vmem>>, vector<1x8x128xf32>
    %29 = vector.shape_cast %28 : vector<1x8x128xf32> to vector<8x128xf32>
    %c32 = arith.constant 32 : index
    %c0_25 = arith.constant 0 : index
    %30 = vector.load %arg10[%c32, %c0_25] : memref<80x128xf32, #tpu.memory_space<vmem>>, vector<8x128xf32>
    tpu.vector_store %arg10[%c32, %c0_25], %29 {strides = array<i32>} : memref<80x128xf32, #tpu.memory_space<vmem>>, vector<8x128xf32>,
    %c1_26 = arith.constant 1 : index
    %c0_27 = arith.constant 0 : index
    %c0_28 = arith.constant 0 : index
    %31 = vector.load %arg1[%c1_26, %c0_27, %c0_28] : memref<4x8x128xf32, #tpu.memory_space<vmem>>, vector<1x8x128xf32>
    %32 = vector.shape_cast %31 : vector<1x8x128xf32> to vector<8x128xf32>
    %c40 = arith.constant 40 : index
    %c0_29 = arith.constant 0 : index
    %33 = vector.load %arg10[%c40, %c0_29] : memref<80x128xf32, #tpu.memory_space<vmem>>, vector<8x128xf32>
    tpu.vector_store %arg10[%c40, %c0_29], %32 {strides = array<i32>} : memref<80x128xf32, #tpu.memory_space<vmem>>, vector<8x128xf32>,
    %c3_30 = arith.constant 3 : index
    %c0_31 = arith.constant 0 : index
    %c0_32 = arith.constant 0 : index
    %34 = vector.load %arg1[%c3_30, %c0_31, %c0_32] : memref<4x8x128xf32, #tpu.memory_space<vmem>>, vector<1x8x128xf32>
    %35 = vector.shape_cast %34 : vector<1x8x128xf32> to vector<8x128xf32>
    %c1_i32_33 = arith.constant 1 : i32
    %36 = tpu.dynamic_rotate %35 by %c1_i32_33 dim 1 : vector<8x128xf32>, i32 -> vector<8x128xf32>
    %c3_34 = arith.constant 3 : index
    %c0_35 = arith.constant 0 : index
    %37 = vector.load %arg2[%c3_34, %c0_35] : memref<9x128xf32, #tpu.memory_space<vmem>>, vector<1x128xf32>
    %38 = vector.broadcast %37 : vector<1x128xf32> to vector<8x128xf32>
    %39 = arith.mulf %36, %38 : vector<8x128xf32>
    %c48 = arith.constant 48 : index
    %c0_36 = arith.constant 0 : index
    %40 = vector.load %arg10[%c48, %c0_36] : memref<80x128xf32, #tpu.memory_space<vmem>>, vector<8x128xf32>
    tpu.vector_store %arg10[%c48, %c0_36], %39 {strides = array<i32>} : memref<80x128xf32, #tpu.memory_space<vmem>>, vector<8x128xf32>,
    %c2_37 = arith.constant 2 : index
    %c0_38 = arith.constant 0 : index
    %c0_39 = arith.constant 0 : index
    %41 = vector.load %arg1[%c2_37, %c0_38, %c0_39] : memref<4x8x128xf32, #tpu.memory_space<vmem>>, vector<1x8x128xf32>
    %42 = vector.shape_cast %41 : vector<1x8x128xf32> to vector<8x128xf32>
    %c56 = arith.constant 56 : index
    %c0_40 = arith.constant 0 : index
    %43 = vector.load %arg10[%c56, %c0_40] : memref<80x128xf32, #tpu.memory_space<vmem>>, vector<8x128xf32>
    tpu.vector_store %arg10[%c56, %c0_40], %42 {strides = array<i32>} : memref<80x128xf32, #tpu.memory_space<vmem>>, vector<8x128xf32>,
    %c3_41 = arith.constant 3 : index
    %c0_42 = arith.constant 0 : index
    %c0_43 = arith.constant 0 : index
    %44 = vector.load %arg1[%c3_41, %c0_42, %c0_43] : memref<4x8x128xf32, #tpu.memory_space<vmem>>, vector<1x8x128xf32>
    %45 = vector.shape_cast %44 : vector<1x8x128xf32> to vector<8x128xf32>
    %c64 = arith.constant 64 : index
    %c0_44 = arith.constant 0 : index
    %46 = vector.load %arg10[%c64, %c0_44] : memref<80x128xf32, #tpu.memory_space<vmem>>, vector<8x128xf32>
    tpu.vector_store %arg10[%c64, %c0_44], %45 {strides = array<i32>} : memref<80x128xf32, #tpu.memory_space<vmem>>, vector<8x128xf32>,
    %c0_45 = arith.constant 0 : index
    %c0_46 = arith.constant 0 : index
    %c0_47 = arith.constant 0 : index
    %47 = vector.load %arg1[%c0_45, %c0_46, %c0_47] : memref<4x8x128xf32, #tpu.memory_space<vmem>>, vector<1x8x128xf32>
    %48 = vector.shape_cast %47 : vector<1x8x128xf32> to vector<8x128xf32>
    %c72 = arith.constant 72 : index
    %c0_48 = arith.constant 0 : index
    %49 = vector.load %arg10[%c72, %c0_48] : memref<80x128xf32, #tpu.memory_space<vmem>>, vector<8x128xf32>
    tpu.vector_store %arg10[%c72, %c0_48], %48 {strides = array<i32>} : memref<80x128xf32, #tpu.memory_space<vmem>>, vector<8x128xf32>,
    %c0_49 = arith.constant 0 : index
    %c0_50 = arith.constant 0 : index
    %50 = vector.load %arg3[%c0_49, %c0_50] : memref<16x80xbf16, #tpu.memory_space<vmem>>, vector<16x80xbf16>
    %c0_51 = arith.constant 0 : index
    %c0_52 = arith.constant 0 : index
    %51 = vector.load %arg10[%c0_51, %c0_52] : memref<80x128xf32, #tpu.memory_space<vmem>>, vector<80x128xf32>
    %52 = arith.truncf %51 : vector<80x128xf32> to vector<80x128xbf16>
    %cst = arith.constant dense<0.000000e+00> : vector<16x128xf32>
    %53 = tpu.matmul %50, %52, %cst {dimension_numbers = #tpu.dot_dimension_numbers<[1], [0], [0], [1], [0, 0, 1, 1], [], []>} : vector<16x80xbf16>, vector<80x128xbf16>, vector<16x128xf32> -> vector<16x128xf32>
    %54 = vector.extract_strided_slice %53 {offsets = [0, 0], sizes = [8, 128], strides = [1, 1]} : vector<16x128xf32> to vector<8x128xf32>
    %55 = vector.extract_strided_slice %53 {offsets = [8, 0], sizes = [8, 128], strides = [1, 1]} : vector<16x128xf32> to vector<8x128xf32>
    %cst_53 = arith.constant dense<0.000000e+00> : vector<8xf32>
    %56 = vector.multi_reduction <add>, %54, %cst_53 [1] : vector<8x128xf32> to vector<8xf32>
    %57 = vector.shape_cast %56 : vector<8xf32> to vector<8x1xf32>
    %cst_54 = arith.constant 7.812500e-03 : f32
    %58 = vector.broadcast %cst_54 : f32 to vector<8x1xf32>
    %59 = arith.mulf %57, %58 : vector<8x1xf32>
    %60 = vector.broadcast %59 : vector<8x1xf32> to vector<8x128xf32>
    %61 = arith.subf %54, %60 : vector<8x128xf32>
    %62 = arith.mulf %61, %61 : vector<8x128xf32>
    %cst_55 = arith.constant dense<0.000000e+00> : vector<8xf32>
    %63 = vector.multi_reduction <add>, %62, %cst_55 [1] : vector<8x128xf32> to vector<8xf32>
    %64 = vector.shape_cast %63 : vector<8xf32> to vector<8x1xf32>
    %cst_56 = arith.constant 7.812500e-03 : f32
    %65 = vector.broadcast %cst_56 : f32 to vector<8x1xf32>
    %66 = arith.mulf %64, %65 : vector<8x1xf32>
    %c0_57 = arith.constant 0 : index
    %c0_58 = arith.constant 0 : index
    %67 = vector.load %arg4[%c0_57, %c0_58] : memref<8x1xf32, #tpu.memory_space<vmem>>, vector<8x1xf32>
    %cst_59 = arith.constant 9.99999974E-6 : f32
    %68 = vector.broadcast %cst_59 : f32 to vector<8x1xf32>
    %69 = arith.addf %66, %68 : vector<8x1xf32>
    %70 = math.rsqrt %69 : vector<8x1xf32>
    %71 = arith.mulf %67, %70 : vector<8x1xf32>
    %72 = vector.broadcast %71 : vector<8x1xf32> to vector<8x128xf32>
    %73 = arith.mulf %61, %72 : vector<8x128xf32>
    %c0_60 = arith.constant 0 : index
    %c0_61 = arith.constant 0 : index
    %74 = vector.load %arg5[%c0_60, %c0_61] : memref<8x1xf32, #tpu.memory_space<vmem>>, vector<8x1xf32>
    %75 = vector.broadcast %74 : vector<8x1xf32> to vector<8x128xf32>
    %76 = arith.addf %73, %75 : vector<8x128xf32>
    %cst_62 = arith.constant 0.000000e+00 : f32
    %77 = vector.broadcast %cst_62 : f32 to vector<8x128xf32>
    %78 = arith.maximumf %76, %77 : vector<8x128xf32>
    %c9_i32_63 = arith.constant 9 : i32
    %79 = tpu.dynamic_rotate %78 by %c9_i32_63 dim 1 : vector<8x128xf32>, i32 -> vector<8x128xf32>
    %c0_64 = arith.constant 0 : index
    %c0_65 = arith.constant 0 : index
    %80 = vector.load %arg2[%c0_64, %c0_65] : memref<9x128xf32, #tpu.memory_space<vmem>>, vector<1x128xf32>
    %81 = vector.broadcast %80 : vector<1x128xf32> to vector<8x128xf32>
    %82 = arith.mulf %79, %81 : vector<8x128xf32>
    %c0_66 = arith.constant 0 : index
    %c0_67 = arith.constant 0 : index
    %83 = vector.load %arg11[%c0_66, %c0_67] : memref<72x128xf32, #tpu.memory_space<vmem>>, vector<8x128xf32>
    tpu.vector_store %arg11[%c0_66, %c0_67], %82 {strides = array<i32>} : memref<72x128xf32, #tpu.memory_space<vmem>>, vector<8x128xf32>,
    %c8_i32_68 = arith.constant 8 : i32
    %84 = tpu.dynamic_rotate %78 by %c8_i32_68 dim 1 : vector<8x128xf32>, i32 -> vector<8x128xf32>
    %c1_69 = arith.constant 1 : index
    %c0_70 = arith.constant 0 : index
    %85 = vector.load %arg2[%c1_69, %c0_70] : memref<9x128xf32, #tpu.memory_space<vmem>>, vector<1x128xf32>
    %86 = vector.broadcast %85 : vector<1x128xf32> to vector<8x128xf32>
    %87 = arith.mulf %84, %86 : vector<8x128xf32>
    %c8_71 = arith.constant 8 : index
    %c0_72 = arith.constant 0 : index
    %88 = vector.load %arg11[%c8_71, %c0_72] : memref<72x128xf32, #tpu.memory_space<vmem>>, vector<8x128xf32>
    tpu.vector_store %arg11[%c8_71, %c0_72], %87 {strides = array<i32>} : memref<72x128xf32, #tpu.memory_space<vmem>>, vector<8x128xf32>,
    %c7_i32 = arith.constant 7 : i32
    %89 = tpu.dynamic_rotate %78 by %c7_i32 dim 1 : vector<8x128xf32>, i32 -> vector<8x128xf32>
    %c2_73 = arith.constant 2 : index
    %c0_74 = arith.constant 0 : index
    %90 = vector.load %arg2[%c2_73, %c0_74] : memref<9x128xf32, #tpu.memory_space<vmem>>, vector<1x128xf32>
    %91 = vector.broadcast %90 : vector<1x128xf32> to vector<8x128xf32>
    %92 = arith.mulf %89, %91 : vector<8x128xf32>
    %c16_75 = arith.constant 16 : index
    %c0_76 = arith.constant 0 : index
    %93 = vector.load %arg11[%c16_75, %c0_76] : memref<72x128xf32, #tpu.memory_space<vmem>>, vector<8x128xf32>
    tpu.vector_store %arg11[%c16_75, %c0_76], %92 {strides = array<i32>} : memref<72x128xf32, #tpu.memory_space<vmem>>, vector<8x128xf32>,
    %c1_i32_77 = arith.constant 1 : i32
    %94 = tpu.dynamic_rotate %78 by %c1_i32_77 dim 1 : vector<8x128xf32>, i32 -> vector<8x128xf32>
    %c3_78 = arith.constant 3 : index
    %c0_79 = arith.constant 0 : index
    %95 = vector.load %arg2[%c3_78, %c0_79] : memref<9x128xf32, #tpu.memory_space<vmem>>, vector<1x128xf32>
    %96 = vector.broadcast %95 : vector<1x128xf32> to vector<8x128xf32>
    %97 = arith.mulf %94, %96 : vector<8x128xf32>
    %c24_80 = arith.constant 24 : index
    %c0_81 = arith.constant 0 : index
    %98 = vector.load %arg11[%c24_80, %c0_81] : memref<72x128xf32, #tpu.memory_space<vmem>>, vector<8x128xf32>
    tpu.vector_store %arg11[%c24_80, %c0_81], %97 {strides = array<i32>} : memref<72x128xf32, #tpu.memory_space<vmem>>, vector<8x128xf32>,
    %c32_82 = arith.constant 32 : index
    %c0_83 = arith.constant 0 : index
    %99 = vector.load %arg11[%c32_82, %c0_83] : memref<72x128xf32, #tpu.memory_space<vmem>>, vector<8x128xf32>
    tpu.vector_store %arg11[%c32_82, %c0_83], %78 {strides = array<i32>} : memref<72x128xf32, #tpu.memory_space<vmem>>, vector<8x128xf32>,
    %c127_i32 = arith.constant 127 : i32
    %100 = tpu.dynamic_rotate %78 by %c127_i32 dim 1 : vector<8x128xf32>, i32 -> vector<8x128xf32>
    %c5 = arith.constant 5 : index
    %c0_84 = arith.constant 0 : index
    %101 = vector.load %arg2[%c5, %c0_84] : memref<9x128xf32, #tpu.memory_space<vmem>>, vector<1x128xf32>
    %102 = vector.broadcast %101 : vector<1x128xf32> to vector<8x128xf32>
    %103 = arith.mulf %100, %102 : vector<8x128xf32>
    %c40_85 = arith.constant 40 : index
    %c0_86 = arith.constant 0 : index
    %104 = vector.load %arg11[%c40_85, %c0_86] : memref<72x128xf32, #tpu.memory_space<vmem>>, vector<8x128xf32>
    tpu.vector_store %arg11[%c40_85, %c0_86], %103 {strides = array<i32>} : memref<72x128xf32, #tpu.memory_space<vmem>>, vector<8x128xf32>,
    %c121_i32 = arith.constant 121 : i32
    %105 = tpu.dynamic_rotate %78 by %c121_i32 dim 1 : vector<8x128xf32>, i32 -> vector<8x128xf32>
    %c6 = arith.constant 6 : index
    %c0_87 = arith.constant 0 : index
    %106 = vector.load %arg2[%c6, %c0_87] : memref<9x128xf32, #tpu.memory_space<vmem>>, vector<1x128xf32>
    %107 = vector.broadcast %106 : vector<1x128xf32> to vector<8x128xf32>
    %108 = arith.mulf %105, %107 : vector<8x128xf32>
    %c48_88 = arith.constant 48 : index
    %c0_89 = arith.constant 0 : index
    %109 = vector.load %arg11[%c48_88, %c0_89] : memref<72x128xf32, #tpu.memory_space<vmem>>, vector<8x128xf32>
    tpu.vector_store %arg11[%c48_88, %c0_89], %108 {strides = array<i32>} : memref<72x128xf32, #tpu.memory_space<vmem>>, vector<8x128xf32>,
    %c120_i32 = arith.constant 120 : i32
    %110 = tpu.dynamic_rotate %78 by %c120_i32 dim 1 : vector<8x128xf32>, i32 -> vector<8x128xf32>
    %c7 = arith.constant 7 : index
    %c0_90 = arith.constant 0 : index
    %111 = vector.load %arg2[%c7, %c0_90] : memref<9x128xf32, #tpu.memory_space<vmem>>, vector<1x128xf32>
    %112 = vector.broadcast %111 : vector<1x128xf32> to vector<8x128xf32>
    %113 = arith.mulf %110, %112 : vector<8x128xf32>
    %c56_91 = arith.constant 56 : index
    %c0_92 = arith.constant 0 : index
    %114 = vector.load %arg11[%c56_91, %c0_92] : memref<72x128xf32, #tpu.memory_space<vmem>>, vector<8x128xf32>
    tpu.vector_store %arg11[%c56_91, %c0_92], %113 {strides = array<i32>} : memref<72x128xf32, #tpu.memory_space<vmem>>, vector<8x128xf32>,
    %c119_i32 = arith.constant 119 : i32
    %115 = tpu.dynamic_rotate %78 by %c119_i32 dim 1 : vector<8x128xf32>, i32 -> vector<8x128xf32>
    %c8_93 = arith.constant 8 : index
    %c0_94 = arith.constant 0 : index
    %116 = vector.load %arg2[%c8_93, %c0_94] : memref<9x128xf32, #tpu.memory_space<vmem>>, vector<1x128xf32>
    %117 = vector.broadcast %116 : vector<1x128xf32> to vector<8x128xf32>
    %118 = arith.mulf %115, %117 : vector<8x128xf32>
    %c64_95 = arith.constant 64 : index
    %c0_96 = arith.constant 0 : index
    %119 = vector.load %arg11[%c64_95, %c0_96] : memref<72x128xf32, #tpu.memory_space<vmem>>, vector<8x128xf32>
    tpu.vector_store %arg11[%c64_95, %c0_96], %118 {strides = array<i32>} : memref<72x128xf32, #tpu.memory_space<vmem>>, vector<8x128xf32>,
    %c0_97 = arith.constant 0 : index
    %c0_98 = arith.constant 0 : index
    %120 = vector.load %arg6[%c0_97, %c0_98] : memref<8x72xbf16, #tpu.memory_space<vmem>>, vector<8x72xbf16>
    %c0_99 = arith.constant 0 : index
    %c0_100 = arith.constant 0 : index
    %121 = vector.load %arg11[%c0_99, %c0_100] : memref<72x128xf32, #tpu.memory_space<vmem>>, vector<72x128xf32>
    %122 = arith.truncf %121 : vector<72x128xf32> to vector<72x128xbf16>
    %cst_101 = arith.constant dense<0.000000e+00> : vector<8x128xf32>
    %123 = tpu.matmul %120, %122, %cst_101 {dimension_numbers = #tpu.dot_dimension_numbers<[1], [0], [0], [1], [0, 0, 1, 1], [], []>} : vector<8x72xbf16>, vector<72x128xbf16>, vector<8x128xf32> -> vector<8x128xf32>
    %cst_102 = arith.constant dense<0.000000e+00> : vector<8xf32>
    %124 = vector.multi_reduction <add>, %123, %cst_102 [1] : vector<8x128xf32> to vector<8xf32>
    %125 = vector.shape_cast %124 : vector<8xf32> to vector<8x1xf32>
    %cst_103 = arith.constant 7.812500e-03 : f32
    %126 = vector.broadcast %cst_103 : f32 to vector<8x1xf32>
    %127 = arith.mulf %125, %126 : vector<8x1xf32>
    %128 = vector.broadcast %127 : vector<8x1xf32> to vector<8x128xf32>
    %129 = arith.subf %123, %128 : vector<8x128xf32>
    %130 = arith.mulf %129, %129 : vector<8x128xf32>
    %cst_104 = arith.constant dense<0.000000e+00> : vector<8xf32>
    %131 = vector.multi_reduction <add>, %130, %cst_104 [1] : vector<8x128xf32> to vector<8xf32>
    %132 = vector.shape_cast %131 : vector<8xf32> to vector<8x1xf32>
    %cst_105 = arith.constant 7.812500e-03 : f32
    %133 = vector.broadcast %cst_105 : f32 to vector<8x1xf32>
    %134 = arith.mulf %132, %133 : vector<8x1xf32>
    %c0_106 = arith.constant 0 : index
    %c0_107 = arith.constant 0 : index
    %135 = vector.load %arg7[%c0_106, %c0_107] : memref<8x1xf32, #tpu.memory_space<vmem>>, vector<8x1xf32>
    %cst_108 = arith.constant 9.99999974E-6 : f32
    %136 = vector.broadcast %cst_108 : f32 to vector<8x1xf32>
    %137 = arith.addf %134, %136 : vector<8x1xf32>
    %138 = math.rsqrt %137 : vector<8x1xf32>
    %139 = arith.mulf %135, %138 : vector<8x1xf32>
    %140 = vector.broadcast %139 : vector<8x1xf32> to vector<8x128xf32>
    %141 = arith.mulf %129, %140 : vector<8x128xf32>
    %c0_109 = arith.constant 0 : index
    %c0_110 = arith.constant 0 : index
    %142 = vector.load %arg8[%c0_109, %c0_110] : memref<8x1xf32, #tpu.memory_space<vmem>>, vector<8x1xf32>
    %143 = vector.broadcast %142 : vector<8x1xf32> to vector<8x128xf32>
    %144 = arith.addf %141, %143 : vector<8x128xf32>
    %145 = arith.addf %144, %55 : vector<8x128xf32>
    %cst_111 = arith.constant 0.000000e+00 : f32
    %146 = vector.broadcast %cst_111 : f32 to vector<8x128xf32>
    %147 = arith.maximumf %145, %146 : vector<8x128xf32>
    %c0_112 = arith.constant 0 : index
    %c0_113 = arith.constant 0 : index
    %148 = vector.load %arg9[%c0_112, %c0_113] : memref<8x128xf32, #tpu.memory_space<vmem>>, vector<8x128xf32>
    tpu.vector_store %arg9[%c0_112, %c0_113], %147 {strides = array<i32>} : memref<8x128xf32, #tpu.memory_space<vmem>>, vector<8x128xf32>,
    return
  }
  func.func @transform_0(%arg0: i32) -> (i32, i32, i32) {
    %c0_i32 = arith.constant 0 : i32
    %c0_i32_0 = arith.constant 0 : i32
    %c0_i32_1 = arith.constant 0 : i32
    %c0_i32_2 = arith.constant 0 : i32
    return %c0_i32, %c0_i32_0, %c0_i32_1 : i32, i32, i32
  }
  func.func @transform_1(%arg0: i32) -> (i32, i32) {
    %c0_i32 = arith.constant 0 : i32
    %c0_i32_0 = arith.constant 0 : i32
    %c0_i32_1 = arith.constant 0 : i32
    return %c0_i32, %c0_i32_0 : i32, i32
  }
  func.func @transform_2(%arg0: i32) -> (i32, i32) {
    %c0_i32 = arith.constant 0 : i32
    %c0_i32_0 = arith.constant 0 : i32
    %c0_i32_1 = arith.constant 0 : i32
    return %c0_i32, %c0_i32_0 : i32, i32
  }
  func.func @transform_3(%arg0: i32) -> (i32, i32) {
    %c0_i32 = arith.constant 0 : i32
    %c0_i32_0 = arith.constant 0 : i32
    %c0_i32_1 = arith.constant 0 : i32
    return %c0_i32, %c0_i32_0 : i32, i32
  }
  func.func @transform_4(%arg0: i32) -> (i32, i32) {
    %c0_i32 = arith.constant 0 : i32
    %c0_i32_0 = arith.constant 0 : i32
    %c0_i32_1 = arith.constant 0 : i32
    return %c0_i32, %c0_i32_0 : i32, i32
  }
  func.func @transform_5(%arg0: i32) -> (i32, i32) {
    %c0_i32 = arith.constant 0 : i32
    %c0_i32_0 = arith.constant 0 : i32
    %c0_i32_1 = arith.constant 0 : i32
    return %c0_i32, %c0_i32_0 : i32, i32
  }
  func.func @transform_6(%arg0: i32) -> (i32, i32) {
    %c0_i32 = arith.constant 0 : i32
    %c0_i32_0 = arith.constant 0 : i32
    %c0_i32_1 = arith.constant 0 : i32
    return %c0_i32, %c0_i32_0 : i32, i32
  }
  func.func @transform_7(%arg0: i32) -> (i32, i32) {
    %c0_i32 = arith.constant 0 : i32
    %c0_i32_0 = arith.constant 0 : i32
    %c0_i32_1 = arith.constant 0 : i32
    return %c0_i32, %c0_i32_0 : i32, i32
  }
  func.func @transform_8(%arg0: i32) -> (i32, i32) {
    %c0_i32 = arith.constant 0 : i32
    %c0_i32_0 = arith.constant 0 : i32
    %c0_i32_1 = arith.constant 0 : i32
    return %c0_i32, %c0_i32_0 : i32, i32
  }
}

</mosaic_0001>

<bundles_post_ra>
// kernel: tpu_custom_call.1
= control target key start
LH: loop header
LB: loop body
LE: loop exit
PB: predicated region body
PF: predicated region fallthrough
CT: control target
= control target key end

     0   :  { %13 = vsyncpa [#allocation5], 0  ;;  %s991_s0 = inlined_call_operand.hbm [shape: f32[4,8,128], index: 0, kind: input, shape index: {}]   ;;  %s992_s1 = inlined_call_operand.hbm [shape: f32[9,128], index: 1, kind: input, shape index: {}]   ;;  %s993_s2 = inlined_call_operand.hbm [shape: bf16[16,80], index: 2, kind: input, shape index: {}]   ;;  %s994_s3 = inlined_call_operand.hbm [shape: f32[8,1], index: 3, kind: input, shape index: {}]   ;;  %s995_s4 = inlined_call_operand.hbm [shape: f32[8,1], index: 4, kind: input, shape index: {}]   ;;  %s996_s5 = inlined_call_operand.hbm [shape: bf16[8,72], index: 5, kind: input, shape index: {}]   ;;  %s997_s6 = inlined_call_operand.hbm [shape: f32[8,1], index: 6, kind: input, shape index: {}]   ;;  %s998_s7 = inlined_call_operand.hbm [shape: f32[8,1], index: 7, kind: input, shape index: {}]   ;;  %s999_s8 = inlined_call_operand.hbm [shape: f32[8,128], index: 8, kind: output, shape index: {}]  }
   0x1   :  { %14 = vsyncpa [#allocation8], 0 }
   0x2   :  { %15 = vsyncpa [#allocation11], 0 }
   0x3   :  { %16 = vsyncpa [#allocation14], 0 }
   0x4   :  { %17 = vsyncpa [#allocation17], 0 }
   0x5   :  { %18 = vsyncpa [#allocation6], 0  ;;  %s765_s27 = smov [#allocation7]   ;;  %s766_s29 = smov [#allocation10]  }
   0x6   :  { %s36_s28 = sshll.u32 %s765_s27, 4  ;;  %s61_s30 = sshll.u32 %s766_s29, 4  ;;  %s37_s28 = int_to_ptr.vmem [resolvable:$true] %s36_s28  ;;  %s62_s30 = int_to_ptr.vmem [resolvable:$true] %s61_s30 }
   0x7   :  { %s555_s11 = scalar_lea.hbm %s992_s1, 256 }
   0x8   :  { %p556_p0 = scmp.ne.s32.totalorder %s992_s1, %s555_s11  ;;  %p559_p1 = scmp.lt.u32.totalorder %s555_s11, %s992_s1 }
   0xa   :  { %p561_p2 = pnand %p559_p1, %p556_p0 }
   0xc   :  { %564 = shalt.err (!%p561_p2)
}
   0xd   :  { %s565_s16 = scalar_lea.vmem %s37_s28, 256  ;;  %p570_p4 = scmp.lt.s32.totalorder %s37_s28, %s37_s28 }
   0xe   :  { %p566_p3 = scmp.ne.s32.totalorder %s37_s28, %s565_s16  ;;  %p571_p5 = scmp.lt.s32.totalorder %s565_s16, %s565_s16 }
  0x10   :  { %p572_p6 = por %p571_p5, %p570_p4 }
  0x12   :  { %p573_p7 = pnand %p572_p6, %p566_p3 }
  0x14   :  { %576 = shalt.err (!%p573_p7)
}
  0x15   :  { %s767_s17 = smov 128   ;;  %s768_s18 = smov 8  }
  0x16   :  { %42 = dma.hbm_to_vmem [thread:$0]  %s992_s1, 256, %s37_s28, [#allocation8], %s767_s17, %s767_s17, %s768_s18  }
  0x17   :  { %s577_s23 = scalar_lea.hbm %s994_s3, 128 }
  0x18   :  { %p578_p8 = scmp.ne.s32.totalorder %s994_s3, %s577_s23  ;;  %p581_p9 = scmp.lt.u32.totalorder %s577_s23, %s994_s3 }
  0x1a   :  { %p583_p10 = pnand %p581_p9, %p578_p8 }
  0x1c   :  { %586 = shalt.err (!%p583_p10)
}
  0x1d   :  { %s587_s29 = scalar_lea.vmem %s62_s30, 128  ;;  %p592_p12 = scmp.lt.s32.totalorder %s62_s30, %s62_s30 }
  0x1e   :  { %p588_p11 = scmp.ne.s32.totalorder %s62_s30, %s587_s29  ;;  %p593_p13 = scmp.lt.s32.totalorder %s587_s29, %s587_s29 }
  0x20   :  { %p594_p0 = por %p593_p13, %p592_p12 }
  0x22   :  { %p595_p1 = pnand %p594_p0, %p588_p11 }
  0x24   :  { %598 = shalt.err (!%p595_p1)
}
  0x25   :  { %64 = dma.hbm_to_vmem [thread:$0]  %s994_s3, 128, %s62_s30, [#allocation11]  }
  0x26   :  { %s769_s9 = smov [#allocation13]   ;;  %s770_s11 = smov [#allocation4]  }
  0x27   :  { %s81_s10 = sshll.u32 %s769_s9, 4  ;;  %s24_s12 = sshll.u32 %s770_s11, 4  ;;  %s82_s10 = int_to_ptr.vmem [resolvable:$true] %s81_s10  ;;  %s860_s12 = int_to_ptr.vmem [resolvable:$true] %s24_s12 }
  0x28   :  { %s599_s15 = scalar_lea.hbm %s996_s5, 64 }
  0x29   :  { %p600_p2 = scmp.ne.s32.totalorder %s996_s5, %s599_s15  ;;  %p603_p3 = scmp.lt.u32.totalorder %s599_s15, %s996_s5 }
  0x2b   :  { %p605_p4 = pnand %p603_p3, %p600_p2 }
  0x2d   :  { %608 = shalt.err (!%p605_p4)
}
  0x2e   :  { %s609_s3 = scalar_lea.vmem %s82_s10, 64  ;;  %p614_p6 = scmp.lt.s32.totalorder %s82_s10, %s82_s10 }
  0x2f   :  { %p610_p5 = scmp.ne.s32.totalorder %s82_s10, %s609_s3  ;;  %p615_p7 = scmp.lt.s32.totalorder %s609_s3, %s609_s3 }
  0x31   :  { %p616_p8 = por %p615_p7, %p614_p6 }
  0x33   :  { %p617_p9 = pnand %p616_p8, %p610_p5 }
  0x35   :  { %620 = shalt.err (!%p617_p9)
}
  0x36   :  { %84 = dma.hbm_to_vmem [thread:$0]  %s996_s5, 64, %s82_s10, [#allocation14]  }
  0x37   :  { %s621_s25 = scalar_lea.hbm %s991_s0, 512 }
  0x38   :  { %p622_p10 = scmp.ne.s32.totalorder %s991_s0, %s621_s25  ;;  %p625_p11 = scmp.lt.u32.totalorder %s621_s25, %s991_s0 }
  0x3a   :  { %p627_p12 = pnand %p625_p11, %p622_p10 }
  0x3c   :  { %630 = shalt.err (!%p627_p12)
}
  0x3d   :  { %s631_s28 = scalar_lea.vmem %s860_s12, 512  ;;  %p636_p0 = scmp.lt.s32.totalorder %s860_s12, %s860_s12 }
  0x3e   :  { %p632_p13 = scmp.ne.s32.totalorder %s860_s12, %s631_s28  ;;  %p637_p1 = scmp.lt.s32.totalorder %s631_s28, %s631_s28 }
  0x40   :  { %p638_p2 = por %p637_p1, %p636_p0 }
  0x42   :  { %p639_p3 = pnand %p638_p2, %p632_p13 }
  0x44   :  { %642 = shalt.err (!%p639_p3)
}
  0x45   :  { %30 = dma.hbm_to_vmem [thread:$0]  %s991_s0, 512, %s860_s12, [#allocation5], %s767_s17, %s767_s17, %s768_s18  }
  0x46   :  { %s771_s10 = smov [#allocation9]   ;;  %s643_s15 = scalar_lea.hbm %s993_s2, 128 }
  0x47   :  { %s48_s11 = sshll.u32 %s771_s10, 4  ;;  %p644_p4 = scmp.ne.s32.totalorder %s993_s2, %s643_s15  ;;  %s49_s11 = int_to_ptr.vmem [resolvable:$true] %s48_s11 }
  0x48   :  { %p647_p5 = scmp.lt.u32.totalorder %s643_s15, %s993_s2 }
  0x4a   :  { %p649_p6 = pnand %p647_p5, %p644_p4 }
  0x4c   :  { %652 = shalt.err (!%p649_p6)
}
  0x4d   :  { %s653_s3 = scalar_lea.vmem %s49_s11, 128  ;;  %p658_p8 = scmp.lt.s32.totalorder %s49_s11, %s49_s11 }
  0x4e   :  { %p654_p7 = scmp.ne.s32.totalorder %s49_s11, %s653_s3  ;;  %p659_p9 = scmp.lt.s32.totalorder %s653_s3, %s653_s3 }
  0x50   :  { %p660_p10 = por %p659_p9, %p658_p8 }
  0x52   :  { %p661_p11 = pnand %p660_p10, %p654_p7 }
  0x54   :  { %664 = shalt.err (!%p661_p11)
}
  0x55   :  { %s772_s0 = smov 64   ;;  %s773_s17 = smov 4  }
  0x56   :  { %54 = dma.hbm_to_vmem [thread:$0]  %s993_s2, 128, %s49_s11, [#allocation8], %s772_s0, %s772_s0, %s773_s17  }
  0x57   :  { %s774_s22 = smov [#allocation12]   ;;  %s775_s24 = smov [#allocation15]  }
  0x58   :  { %s71_s23 = sshll.u32 %s774_s22, 4  ;;  %s91_s25 = sshll.u32 %s775_s24, 4  ;;  %s72_s23 = int_to_ptr.vmem [resolvable:$true] %s71_s23  ;;  %s92_s25 = int_to_ptr.vmem [resolvable:$true] %s91_s25 }
  0x59   :  { %s665_s29 = scalar_lea.hbm %s995_s4, 128 }
  0x5a   :  { %p666_p12 = scmp.ne.s32.totalorder %s995_s4, %s665_s29  ;;  %p669_p13 = scmp.lt.u32.totalorder %s665_s29, %s995_s4 }
  0x5c   :  { %p671_p0 = pnand %p669_p13, %p666_p12 }
  0x5e   :  { %674 = shalt.err (!%p671_p0)
}
  0x5f   :  { %s675_s2 = scalar_lea.vmem %s72_s23, 128  ;;  %p680_p2 = scmp.lt.s32.totalorder %s72_s23, %s72_s23 }
  0x60   :  { %p676_p1 = scmp.ne.s32.totalorder %s72_s23, %s675_s2  ;;  %p681_p3 = scmp.lt.s32.totalorder %s675_s2, %s675_s2 }
  0x62   :  { %p682_p4 = por %p681_p3, %p680_p2 }
  0x64   :  { %p683_p5 = pnand %p682_p4, %p676_p1 }
  0x66   :  { %686 = shalt.err (!%p683_p5)
}
  0x67   :  { %74 = dma.hbm_to_vmem [thread:$0]  %s995_s4, 128, %s72_s23, [#allocation11]  }
  0x68   :  { %s687_s15 = scalar_lea.hbm %s997_s6, 128 }
  0x69   :  { %p688_p6 = scmp.ne.s32.totalorder %s997_s6, %s687_s15  ;;  %p691_p7 = scmp.lt.u32.totalorder %s687_s15, %s997_s6 }
  0x6b   :  { %p693_p8 = pnand %p691_p7, %p688_p6 }
  0x6d   :  { %696 = shalt.err (!%p693_p8)
}
  0x6e   :  { %s697_s3 = scalar_lea.vmem %s92_s25, 128  ;;  %p702_p10 = scmp.lt.s32.totalorder %s92_s25, %s92_s25 }
  0x6f   :  { %p698_p9 = scmp.ne.s32.totalorder %s92_s25, %s697_s3  ;;  %p703_p11 = scmp.lt.s32.totalorder %s697_s3, %s697_s3 }
  0x71   :  { %p704_p12 = por %p703_p11, %p702_p10 }
  0x73   :  { %p705_p13 = pnand %p704_p12, %p698_p9 }
  0x75   :  { %708 = shalt.err (!%p705_p13)
}
  0x76   :  { %94 = dma.hbm_to_vmem [thread:$0]  %s997_s6, 128, %s92_s25, [#allocation14]  }
  0x77   :  { %s776_s17 = smov [#allocation16]   ;;  %s709_s23 = scalar_lea.hbm %s998_s7, 128 }
  0x78   :  { %s101_s12 = sshll.u32 %s776_s17, 4  ;;  %p710_p0 = scmp.ne.s32.totalorder %s998_s7, %s709_s23  ;;  %s102_s12 = int_to_ptr.vmem [resolvable:$true] %s101_s12 }
  0x79   :  { %p713_p1 = scmp.lt.u32.totalorder %s709_s23, %s998_s7 }
  0x7b   :  { %p715_p2 = pnand %p713_p1, %p710_p0 }
  0x7d   :  { %718 = shalt.err (!%p715_p2)
}
  0x7e   :  { %s719_s1 = scalar_lea.vmem %s102_s12, 128  ;;  %p724_p4 = scmp.lt.s32.totalorder %s102_s12, %s102_s12 }
  0x7f   :  { %p720_p3 = scmp.ne.s32.totalorder %s102_s12, %s719_s1  ;;  %p725_p5 = scmp.lt.s32.totalorder %s719_s1, %s719_s1 }
  0x81   :  { %p726_p6 = por %p725_p5, %p724_p4 }
  0x83   :  { %p727_p7 = pnand %p726_p6, %p720_p3 }
  0x85   :  { %730 = shalt.err (!%p727_p7)
}
  0x86   :  { %104 = dma.hbm_to_vmem [thread:$0]  %s998_s7, 128, %s102_s12, [#allocation17]  }
  0x87   :  { %753 = dma.done.wait [#allocation5], 512  }
  0x88   :  { %754 = vsyncadd [#allocation5], 4294966784 }
  0x89   :  { %755 = dma.done.wait [#allocation8], 384  }
  0x8a   :  { %756 = vsyncadd [#allocation8], 4294966912 }
  0x8b   :  { %757 = dma.done.wait [#allocation11], 256  }
  0x8c   :  { %758 = vsyncadd [#allocation11], 4294967040 }
  0x8d   :  { %759 = dma.done.wait [#allocation14], 192  }
  0x8e   :  { %760 = vsyncadd [#allocation14], 4294967104 }
  0x8f   :  { %761 = dma.done.wait [#allocation17], 128  }
  0x90   :  { %762 = vsyncadd [#allocation17], 4294967168  ;;  %v777_v0 = vmov 0.0   ;;  %v152_v1 = vld [vmem:[#allocation4 + $0x18] sm:$0xff]  ;;  %s778_s28 = smov 9   ;;  %v163_v2 = vld [vmem:[#allocation4 + $0x8] sm:$0xff] }
  0x91   :  { %497 = vmatprep.subr.bf16.mxu0 %v777_v0  ;;  %511 = vmatprep.subr.bf16.mxu1 %v777_v0  ;;  %v142_v3 = vld [vmem:[#allocation4 + $0x10] sm:$0xff]  ;;  %s779_s7 = smov 1   ;;  %vm780_vm0 = vmmov 0   ;;  %v951_v6 = vld [vmem:[#allocation7 + $0x1] ss:$0 sm:$0xff]  ;;  %vm215_vm1 = vcmask 654336  }
  0x92   :  { %153 = vrot.lane.b32.xlu1 %v152_v1, %s768_s18  ;;  %132 = vrot.lane.b32.xlu0 %v152_v1, %s778_s28  ;;  %v953_v7 = vld [vmem:[#allocation7] ss:$0 sm:$0xff]  ;;  %v955_v8 = vld [vmem:[#allocation7 + $0x3] ss:$0 sm:$0xff]  ;;  %v550_v23 = vld [vmem:[#allocation9] sm:$0xff]   ;;  %v781_v32 = vmov 0  }
  0x93   :  { %507 = vmatprep.mubr.msk.bf16.mxu0 %vm780_vm0, %v777_v0  ;;  %521 = vmatprep.mubr.msk.bf16.mxu1 %vm780_vm0, %v777_v0  ;;  %v173_v17 = vld [vmem:[#allocation4] sm:$0xff]  ;;  %v268_v37 = vld [vmem:[#allocation10] sm:$0xff]  ;;  %s782_s5 = smov 119   ;;  %s783_s9 = smov 7   ;;  %v483_v61 = vld [vmem:[#allocation7 + $0x8] ss:$0 sm:$0xff] }
  0x94   :  { %v207_v20 = vpack.c.bf16 %v163_v2, %v173_v17  ;;  %v209_v22 = vpack.c.bf16 %v173_v17, %v152_v1  ;;  %548 = vset.pattern.permute.xlu0 %v781_v32  ;;  %549 = vset.pattern.permute.xlu1 %v781_v32  ;;  %v278_v33 = vld [vmem:[#allocation12] sm:$0xff]  ;;  %s784_s2 = smov 127   ;;  %s785_s10 = smov 121   ;;  %vm378_vm2 = vcmask 1043456   ;;  %vm374_vm3 = vcmask 588800  }
  0x95   :  { %s786_s11 = smov 120   ;;  %v478_v51 = vld [vmem:[#allocation7 + $0x2] ss:$0 sm:$0xff]  ;;  %v480_v55 = vld [vmem:[#allocation7 + $0x5] ss:$0 sm:$0xff] }
  0x96   :  { %164 = vrot.lane.b32.xlu1 %v163_v2, %s779_s7  ;;  %143 = vrot.lane.b32.xlu0 %v142_v3, %s768_s18  ;;  %v481_v63 = vld [vmem:[#allocation7 + $0x6] ss:$0 sm:$0xff] }
  0x9a   :  { %178 = vrot.lane.b32.xlu0 %v152_v1, %s779_s7  ;;  %v482_v1 = vld [vmem:[#allocation7 + $0x7] ss:$0 sm:$0xff] }
 0x104   :  { %v154_v4 = vpop.permute.xlu1 %153  ;;  %v133_v5 = vpop.permute.xlu0 %132 }
 0x105   :  { %v139_v11 = vmul.f32 %v953_v7, %v133_v5  ;;  %v160_v13 = vmul.f32 %v951_v6, %v154_v4 }
 0x108   :  { %v165_v9 = vpop.permute.xlu1 %164  ;;  %v144_v10 = vpop.permute.xlu0 %143 }
 0x109   :  { %v150_v12 = vmul.f32 %v951_v6, %v144_v10  ;;  %v171_v14 = vmul.f32 %v955_v8, %v165_v9  ;;  %v359_v9 = vld [vmem:[#allocation13] sm:$0xf] }
 0x10b   :  { %v205_v15 = vpack.c.bf16 %v150_v12, %v139_v11  ;;  %v206_v18 = vpack.c.bf16 %v171_v14, %v160_v13  ;;  %v440_v14 = vld [vmem:[#allocation16] sm:$0xff] }
 0x10c   :  { %v179_v16 = vpop.permute.xlu0 %178 }
 0x10d   :  { %498 = vmatpush3.bf16.msra.mxu0 %v205_v15  ;;  %v185_v19 = vmul.f32 %v955_v8, %v179_v16 }
 0x10e   :  { %499 = vmatprep.subr.bf16.mxu0 %v777_v0 }
 0x10f   :  { %v208_v21 = vpack.c.bf16 %v142_v3, %v185_v19 }
 0x111   :  { %500 = vmatpush3.bf16.msra.mxu0 %v206_v18 }
 0x112   :  { %501 = vmatprep.subr.bf16.mxu0 %v777_v0 }
 0x115   :  { %502 = vmatpush3.bf16.msra.mxu0 %v207_v20 }
 0x116   :  { %503 = vmatprep.subr.bf16.mxu0 %v777_v0 }
 0x119   :  { %504 = vmatpush3.bf16.msra.mxu0 %v208_v21  ;;  %v430_v21 = vld [vmem:[#allocation15] sm:$0xff] }
 0x11a   :  { %505 = vmatprep.subr.bf16.mxu0 %v777_v0 }
 0x11d   :  { %506 = vmatpush3.bf16.msra.mxu0 %v209_v22 }
 0x120   :  { %508 = vmatmul.mubr.msk.bf16.vlgmr.msra.gmra.mrb[0].mxu0 %vm215_vm1, %v550_v23 }
 0x1f3   :  { %v253_v24 = vpop.f32.mrb[0].mxu0 }
 0x1f4   :  { %260 = vadd.xlane.f32.xlu1 %v253_v24  ;;  %v509_v25 = vpop.f32.mrb[1].mxu0 }
 0x1f5   :  { %v966_v26 = vpop.f32.mrb[2].mxu0 }
 0x1f6   :  { %v510_v27 = vpop.f32.mrb[3].mxu0 }
 0x205   :  { %281 = vperm.xlu1 %549, %v278_v33  }
 0x281   :  { %v261_v28 = vpop.xlane.xlu1 %260 }
 0x282   :  { %v262_v29 = vmul.f32 0.0078125, %v261_v28 }
 0x284   :  { %v263_v30 = vsub.f32 %v253_v24, %v262_v29 }
 0x285   :  { %v282_v41 = vpop.permute.xlu1 %281 }
 0x286   :  { %v264_v31 = vmul.f32 %v263_v30, %v263_v30 }
 0x288   :  { %265 = vadd.xlane.f32.xlu0 %v264_v31 }
 0x315   :  { %v266_v34 = vpop.xlane.xlu0 %265 }
 0x316   :  { %v267_v35 = vmul.f32 0.0078125, %v266_v34 }
 0x318   :  { %v269_v36 = vadd.f32 1e-05, %v267_v35 }
 0x31a   :  { %551 = vrsqrt.f32 %v269_v36 }
 0x324   :  { %v552_v38 = vpop.eup %551 }
 0x325   :  { %v271_v39 = vmul.f32 %v552_v38, %v268_v37 }
 0x327   :  { %274 = vperm.xlu0 %548, %v271_v39  }
 0x3a6   :  { %v275_v40 = vpop.permute.xlu0 %274 }
 0x3a7   :  { %v277_v42 = vmul.f32 %v275_v40, %v263_v30 }
 0x3a9   :  { %v284_v43 = vadd.f32 %v282_v41, %v277_v42 }
 0x3ab   :  { %v285_v44 = vmax.f32 %v284_v43, 0.0 }
 0x3ad   :  { %350 = vrot.lane.b32.xlu0 %v285_v44, %s782_s5  ;;  %286 = vrot.lane.b32.xlu1 %v285_v44, %s778_s28 }
 0x3b1   :  { %295 = vrot.lane.b32.xlu1 %v285_v44, %s768_s18  ;;  %s787_s18 = smov [#allocation18]  }
 0x3b2   :  { %s456_s13 = sshll.u32 %s787_s18, 4  ;;  %s457_s13 = int_to_ptr.vmem [resolvable:$true] %s456_s13 }
 0x3b3   :  { %s731_s14 = scalar_lea.vmem %s457_s13, 128  ;;  %p736_p9 = scmp.lt.s32.totalorder %s457_s13, %s457_s13 }
 0x3b4   :  { %p732_p8 = scmp.ne.s32.totalorder %s457_s13, %s731_s14  ;;  %p737_p10 = scmp.lt.s32.totalorder %s731_s14, %s731_s14 }
 0x3b5   :  { %304 = vrot.lane.b32.xlu1 %v285_v44, %s783_s9 }
 0x3b6   :  { %p738_p11 = por %p737_p10, %p736_p9 }
 0x3b8   :  { %p739_p12 = pnand %p738_p11, %p732_p8 }
 0x3b9   :  { %313 = vrot.lane.b32.xlu1 %v285_v44, %s779_s7 }
 0x3bd   :  { %323 = vrot.lane.b32.xlu1 %v285_v44, %s784_s2 }
 0x3c1   :  { %332 = vrot.lane.b32.xlu1 %v285_v44, %s785_s10 }
 0x3c5   :  { %341 = vrot.lane.b32.xlu1 %v285_v44, %s786_s11 }
 0x41f   :  { %v287_v45 = vpop.permute.xlu1 %286  ;;  %v351_v62 = vpop.permute.xlu0 %350 }
 0x420   :  { %v293_v47 = vmul.f32 %v953_v7, %v287_v45  ;;  %v357_v2 = vmul.f32 %v483_v61, %v351_v62 }
 0x422   :  { %v373_v7 = vpack.c.bf16 %v357_v2, %v357_v2 }
 0x423   :  { %v296_v46 = vpop.permute.xlu1 %295 }
 0x424   :  { %v302_v48 = vmul.f32 %v951_v6, %v296_v46 }
 0x426   :  { %v369_v49 = vpack.c.bf16 %v302_v48, %v293_v47 }
 0x427   :  { %v305_v50 = vpop.permute.xlu1 %304 }
 0x428   :  { %512 = vmatpush3.bf16.msra.mxu1 %v369_v49  ;;  %v311_v53 = vmul.f32 %v478_v51, %v305_v50 }
 0x429   :  { %513 = vmatprep.subr.bf16.mxu1 %v777_v0 }
 0x42b   :  { %v314_v52 = vpop.permute.xlu1 %313 }
 0x42c   :  { %v320_v54 = vmul.f32 %v955_v8, %v314_v52  ;;  %v380_v8 = vsel %vm378_vm2, %v373_v7, 0 }
 0x42e   :  { %v370_v56 = vpack.c.bf16 %v320_v54, %v311_v53 }
 0x42f   :  { %v324_v57 = vpop.permute.xlu1 %323 }
 0x430   :  { %v330_v58 = vmul.f32 %v480_v55, %v324_v57  ;;  %514 = vmatpush3.bf16.msra.mxu1 %v370_v56 }
 0x431   :  { %515 = vmatprep.subr.bf16.mxu1 %v777_v0 }
 0x432   :  { %v371_v59 = vpack.c.bf16 %v330_v58, %v285_v44 }
 0x433   :  { %v333_v60 = vpop.permute.xlu1 %332 }
 0x434   :  { %516 = vmatpush3.bf16.msra.mxu1 %v371_v59  ;;  %v339_v4 = vmul.f32 %v481_v63, %v333_v60 }
 0x435   :  { %517 = vmatprep.subr.bf16.mxu1 %v777_v0 }
 0x437   :  { %v342_v3 = vpop.permute.xlu1 %341 }
 0x438   :  { %v348_v5 = vmul.f32 %v482_v1, %v342_v3 }
 0x43a   :  { %v372_v6 = vpack.c.bf16 %v348_v5, %v339_v4 }
 0x43c   :  { %518 = vmatpush3.bf16.msra.mxu1 %v372_v6 }
 0x43d   :  { %519 = vmatprep.subr.bf16.mxu1 %v777_v0 }
 0x440   :  { %520 = vmatpush3.bf16.msra.mxu1 %v380_v8 }
 0x443   :  { %522 = vmatmul.mubr.msk.bf16.vlgmr.msra.gmra.mrb[0].mxu1 %vm374_vm3, %v359_v9 }
 0x516   :  { %v416_v10 = vpop.f32.mrb[0].mxu1 }
 0x517   :  { %422 = vadd.xlane.f32.xlu1 %v416_v10  ;;  %v523_v11 = vpop.f32.mrb[1].mxu1 }
 0x518   :  { %v419_v12 = vpop.f32.mrb[2].mxu1 }
 0x519   :  { %v524_v13 = vpop.f32.mrb[3].mxu1 }
 0x528   :  { %443 = vperm.xlu1 %549, %v440_v14  }
 0x5a4   :  { %v423_v15 = vpop.xlane.xlu1 %422 }
 0x5a5   :  { %v424_v16 = vmul.f32 0.0078125, %v423_v15 }
 0x5a7   :  { %v425_v17 = vsub.f32 %v416_v10, %v424_v16 }
 0x5a8   :  { %v444_v27 = vpop.permute.xlu1 %443 }
 0x5a9   :  { %v426_v18 = vmul.f32 %v425_v17, %v425_v17 }
 0x5ab   :  { %427 = vadd.xlane.f32.xlu0 %v426_v18 }
 0x638   :  { %v428_v19 = vpop.xlane.xlu0 %427 }
 0x639   :  { %v429_v20 = vmul.f32 0.0078125, %v428_v19 }
 0x63b   :  { %v431_v0 = vadd.f32 1e-05, %v429_v20 }
 0x63d   :  { %553 = vrsqrt.f32 %v431_v0 }
 0x647   :  { %v554_v22 = vpop.eup %553 }
 0x648   :  { %v433_v23 = vmul.f32 %v554_v22, %v430_v21 }
 0x64a   :  { %436 = vperm.xlu0 %548, %v433_v23  }
 0x6c9   :  { %v437_v24 = vpop.permute.xlu0 %436 }
 0x6ca   :  { %v439_v25 = vmul.f32 %v437_v24, %v425_v17 }
 0x6cc   :  { %v446_v28 = vadd.f32 %v444_v27, %v439_v25 }
 0x6ce   :  { %v447_v29 = vadd.f32 %v446_v28, %v966_v26 }
 0x6d0   :  { %v448_v30 = vmax.f32 %v447_v29, 0.0 }
 0x6d2   :  { %449 = vst [vmem:[#allocation18] sm:$0xff] %v448_v30 }
 0x6d3   :  { %742 = shalt.err (!%p739_p12)
}
 0x6d4   :  { %s743_s19 = scalar_lea.hbm %s999_s8, 128 }
 0x6d5   :  { %p744_p13 = scmp.ne.s32.totalorder %s999_s8, %s743_s19  ;;  %p747_p0 = scmp.lt.u32.totalorder %s743_s19, %s999_s8 }
 0x6d7   :  { %p749_p1 = pnand %p747_p0, %p744_p13 }
 0x6d9   :  { %752 = shalt.err (!%p749_p1)
}
 0x6da   :  { %459 = dma.vmem_to_hbm [thread:$0]  %s457_s13, 128, %s999_s8, [#allocation6]  }
 0x6db   :  { %763 = dma.done.wait [#allocation6], 128  }
 0x6dc   :  { %764 = vsyncadd [#allocation6], 4294967168 }
 0x6dd   :  { %463 = vsyncpa [#allocation5], 1 }
 0x6de   :  { %464 = vsyncpa [#allocation8], 1 }
 0x6df   :  { %465 = vsyncpa [#allocation11], 1 }
 0x6e0   :  { %466 = vsyncpa [#allocation14], 1 }
 0x6e1   :  { %467 = vsyncpa [#allocation17], 1 }
 0x6e2   :  { %468 = vsyncpa [#allocation6], 1 }

</bundles_post_ra>
